<compile_context>
chip_gen: v5e
topology: v5e:2x2
jax: 0.10.0
libtpu: 0.0.40
codegen_flags: <defaults>
</compile_context>

<pallas_src>
import functools

import jax
import jax.numpy as jnp
from jax.experimental import pallas as pl
from jax.experimental.pallas import tpu as pltpu

BETA_DEFAULT = 1.0 / 9.0
_LANE = 128  # lane width of every tile; weakest alignment requirement (M % 128)


def _round_up(x: int, m: int) -> int:
    return ((x + m - 1) // m) * m


def _target_tile_rows() -> int:
    """Rows per (rows, 128) tile, chosen from the per-generation VMEM budget."""
    try:
        kind = jax.devices()[0].device_kind.lower()
    except Exception:  # pragma: no cover - defensive, e.g. no TPU visible at trace
        kind = ""
    if ("v6" in kind) or ("v7" in kind):
        # 4096*128*4 B = 2 MiB per buffer; 4 buffers (x, t, w, out) double-buffered
        # ~= 16 MiB, inside the 32 MiB default scoped VMEM of v6e / v7x.
        return 4096
    # Conservative default (v5e & unknown): ~8 MiB double-buffered, inside v5e's
    # 16 MiB default scoped VMEM.
    return 2048


def _smooth_l1(x, t, beta: float, half_over_beta: float):
    # target = where(isnan(target), input, target)  -> NaN targets contribute 0 loss
    t = jnp.where(jnp.isnan(t), x, t)
    n = jnp.abs(x - t)
    if beta < 1e-5:                       # static Python branch, matches the module
        return n
    return jnp.where(n < beta, (n * n) * half_over_beta, n - 0.5 * beta)


def _kernel_weighted(x_ref, t_ref, w_ref, o_ref, *, beta: float, half_over_beta: float):
    x = x_ref[...].astype(jnp.float32)
    t = t_ref[...].astype(jnp.float32)
    w = w_ref[...].astype(jnp.float32)
    loss = _smooth_l1(x, t, beta, half_over_beta) * w
    o_ref[...] = loss.astype(o_ref.dtype)


def _kernel_unweighted(x_ref, t_ref, o_ref, *, beta: float, half_over_beta: float):
    x = x_ref[...].astype(jnp.float32)
    t = t_ref[...].astype(jnp.float32)
    loss = _smooth_l1(x, t, beta, half_over_beta)
    o_ref[...] = loss.astype(o_ref.dtype)


def weighted_smooth_l1_loss(inp, target, weights=None, beta: float = BETA_DEFAULT,
                            code_weights=None, tile_rows: int | None = None):
    """Forward of WeightedSmoothL1Loss. Returns the (B, #anchors, #codes) loss."""
    # NOTE: the PyTorch module stores `code_weights` but never uses them in forward();
    # kept for signature parity and likewise ignored here.
    del code_weights

    B, A, C = inp.shape
    assert target.shape == (B, A, C)
    out_dtype = inp.dtype
    M = B * A * C

    # Row-major flatten is free; per-anchor weights broadcast to elementwise size in
    # one fused XLA pass (review's sanctioned fallback to an in-kernel lane repeat).
    ops = [inp.reshape(-1), target.reshape(-1)]
    if weights is not None:
        assert weights.shape == (B, A)
        ops.append(jnp.broadcast_to(weights[..., None], (B, A, C)).reshape(-1))

    # Re-block as lane-dense (rows, 128) tiles.  Only pad when M is not a multiple
    # of 128 -- padding/slicing costs an extra HBM pass, so the aligned (common
    # training-shape) case does zero extra data movement.
    m_pad = _round_up(M, _LANE)
    if m_pad != M:
        ops = [jnp.pad(o, (0, m_pad - M)) for o in ops]
    rows = m_pad // _LANE
    ops = [o.reshape(rows, _LANE) for o in ops]

    # Tile rows: per-generation VMEM budget, capped so the 1-D grid has >=4 steps
    # when there is enough data (keeps both v7x TensorCores busy on the "parallel"
    # axis).  Trailing partial row-blocks are masked by Pallas.
    tr = tile_rows if tile_rows is not None else _target_tile_rows()
    tr = max(8, min(_round_up(tr, 8), _round_up(pl.cdiv(rows, 4), 8)))
    grid = (pl.cdiv(rows, tr),)

    kernel_fn = _kernel_weighted if weights is not None else _kernel_unweighted
    kernel = functools.partial(
        kernel_fn,
        beta=float(beta),
        half_over_beta=(0.5 / float(beta)) if beta >= 1e-5 else 0.0,
    )

    block = pl.BlockSpec((tr, _LANE), lambda i: (i, 0))
    bytes_accessed = (sum(int(o.size) * o.dtype.itemsize for o in ops)
                      + m_pad * jnp.dtype(out_dtype).itemsize)

    out2d = pl.pallas_call(
        kernel,
        out_shape=jax.ShapeDtypeStruct((rows, _LANE), out_dtype),
        grid_spec=pltpu.PrefetchScalarGridSpec(
            num_scalar_prefetch=0,
            grid=grid,
            in_specs=[block] * len(ops),
            out_specs=block,
        ),
        compiler_params=pltpu.CompilerParams(
            dimension_semantics=("parallel",)),
        cost_estimate=pl.CostEstimate(
            flops=8 * m_pad, transcendentals=0, bytes_accessed=int(bytes_accessed)),
    )(*ops)

    out_flat = out2d.reshape(-1)
    if m_pad != M:
        out_flat = out_flat[:M]
    return out_flat.reshape(B, A, C)


def _reference(inp, target, weights, beta):
    t = jnp.where(jnp.isnan(target), inp, target)
    n = jnp.abs(inp - t)
    if beta < 1e-5:
        loss = n
    else:
        loss = jnp.where(n < beta, 0.5 * n * n / beta, n - 0.5 * beta)
    if weights is not None:
        loss = loss * weights[..., None]
    return loss


if __name__ == "__main__":
    key = jax.random.PRNGKey(0)

    def make_case(k, B, A, C, nan_frac=0.1):
        k1, k2, k3, k4 = jax.random.split(k, 4)
        inp = jax.random.normal(k1, (B, A, C), dtype=jnp.float32)
        target = jax.random.normal(k2, (B, A, C), dtype=jnp.float32)
        nan_mask = jax.random.bernoulli(k3, nan_frac, (B, A, C))
        target = jnp.where(nan_mask, jnp.nan, target)
        weights = jax.random.uniform(k4, (B, A), dtype=jnp.float32)
        return inp, target, weights

    k_a, k_b = jax.random.split(key)

    # Case 1: #anchors*#codes not a multiple of 128 -> exercises the padded path.
    B, A, C = 2, 120, 7
    inp, target, weights = make_case(k_a, B, A, C)
    code_weights = jnp.linspace(0.5, 1.5, C, dtype=jnp.float32)  # unused by forward

    out = jax.block_until_ready(
        weighted_smooth_l1_loss(inp, target, weights, beta=BETA_DEFAULT,
                                code_weights=code_weights))
    ref = _reference(inp, target, weights, BETA_DEFAULT)
    assert out.shape == (B, A, C)
    assert jnp.allclose(out, ref, atol=1e-6, rtol=1e-5), "mismatch vs reference (smooth-L1)"

    # pure-L1 branch (beta < 1e-5)
    out_l1 = jax.block_until_ready(
        weighted_smooth_l1_loss(inp, target, weights, beta=0.0))
    assert jnp.allclose(out_l1, _reference(inp, target, weights, 0.0),
                        atol=1e-6, rtol=1e-5), "mismatch vs reference (L1)"

    # no-weights path
    out_nw = jax.block_until_ready(
        weighted_smooth_l1_loss(inp, target, None, beta=BETA_DEFAULT))
    assert jnp.allclose(out_nw, _reference(inp, target, None, BETA_DEFAULT),
                        atol=1e-6, rtol=1e-5), "mismatch vs reference (no weights)"

    # Case 2: B*A*C a multiple of 128 -> zero-copy fast path (no pad / no slice),
    # with a partial trailing row-block in the grid.
    B2, A2, C2 = 2, 448, 7  # M = 6272 = 49 * 128
    inp2, target2, weights2 = make_case(k_b, B2, A2, C2)
    out2 = jax.block_until_ready(
        weighted_smooth_l1_loss(inp2, target2, weights2, beta=BETA_DEFAULT))
    ref2 = _reference(inp2, target2, weights2, BETA_DEFAULT)
    assert out2.shape == (B2, A2, C2)
    assert jnp.allclose(out2, ref2, atol=1e-6, rtol=1e-5), "mismatch vs reference (fast path)"

    print("KERNEL_OK")
</pallas_src>

<mosaic_0001>
module attributes {stable_mosaic.version = 11 : i64} {
  func.func @_kernel_weighted(%arg0: i32, %arg1: memref<8x128xf32, #tpu.memory_space<vmem>>, %arg2: memref<8x128xf32, #tpu.memory_space<vmem>>, %arg3: memref<8x128xf32, #tpu.memory_space<vmem>>, %arg4: memref<8x128xf32, #tpu.memory_space<vmem>>) attributes {dimension_semantics = [#tpu.dimension_semantics<parallel>], iteration_bounds = array<i64: 2>, scalar_prefetch = 0 : i64, scratch_operands = 0 : i64, tpu.core_type = #tpu.core_type<tc>, window_params = [{transform_indices = @transform_0, window_bounds = array<i64: 8, 128>}, {transform_indices = @transform_1, window_bounds = array<i64: 8, 128>}, {transform_indices = @transform_2, window_bounds = array<i64: 8, 128>}, {transform_indices = @transform_3, window_bounds = array<i64: 8, 128>}]} {
    %c0 = arith.constant 0 : index
    %c0_0 = arith.constant 0 : index
    %0 = vector.load %arg1[%c0, %c0_0] : memref<8x128xf32, #tpu.memory_space<vmem>>, vector<8x128xf32>
    %c0_1 = arith.constant 0 : index
    %c0_2 = arith.constant 0 : index
    %1 = vector.load %arg2[%c0_1, %c0_2] : memref<8x128xf32, #tpu.memory_space<vmem>>, vector<8x128xf32>
    %c0_3 = arith.constant 0 : index
    %c0_4 = arith.constant 0 : index
    %2 = vector.load %arg3[%c0_3, %c0_4] : memref<8x128xf32, #tpu.memory_space<vmem>>, vector<8x128xf32>
    %3 = arith.cmpf one, %1, %1 : vector<8x128xf32>
    %4 = arith.select %3, %0, %1 : vector<8x128xi1>, vector<8x128xf32>
    %5 = arith.subf %0, %4 : vector<8x128xf32>
    %6 = math.absf %5 : vector<8x128xf32>
    %cst = arith.constant 0.111111112 : f32
    %7 = vector.broadcast %cst : f32 to vector<8x128xf32>
    %8 = arith.cmpf olt, %6, %7 : vector<8x128xf32>
    %9 = arith.mulf %6, %6 : vector<8x128xf32>
    %cst_5 = arith.constant 4.500000e+00 : f32
    %10 = vector.broadcast %cst_5 : f32 to vector<8x128xf32>
    %11 = arith.mulf %9, %10 : vector<8x128xf32>
    %cst_6 = arith.constant 0.055555556 : f32
    %12 = vector.broadcast %cst_6 : f32 to vector<8x128xf32>
    %13 = arith.subf %6, %12 : vector<8x128xf32>
    %14 = arith.select %8, %11, %13 : vector<8x128xi1>, vector<8x128xf32>
    %15 = arith.mulf %14, %2 : vector<8x128xf32>
    %c0_7 = arith.constant 0 : index
    %c0_8 = arith.constant 0 : index
    %16 = vector.load %arg4[%c0_7, %c0_8] : memref<8x128xf32, #tpu.memory_space<vmem>>, vector<8x128xf32>
    tpu.vector_store %arg4[%c0_7, %c0_8], %15 {strides = array<i32>} : memref<8x128xf32, #tpu.memory_space<vmem>>, vector<8x128xf32>,
    return
  }
  func.func @transform_0(%arg0: i32) -> (i32, i32) {
    %c0_i32 = arith.constant 0 : i32
    %c0_i32_0 = arith.constant 0 : i32
    return %arg0, %c0_i32 : i32, i32
  }
  func.func @transform_1(%arg0: i32) -> (i32, i32) {
    %c0_i32 = arith.constant 0 : i32
    %c0_i32_0 = arith.constant 0 : i32
    return %arg0, %c0_i32 : i32, i32
  }
  func.func @transform_2(%arg0: i32) -> (i32, i32) {
    %c0_i32 = arith.constant 0 : i32
    %c0_i32_0 = arith.constant 0 : i32
    return %arg0, %c0_i32 : i32, i32
  }
  func.func @transform_3(%arg0: i32) -> (i32, i32) {
    %c0_i32 = arith.constant 0 : i32
    %c0_i32_0 = arith.constant 0 : i32
    return %arg0, %c0_i32 : i32, i32
  }
}

</mosaic_0001>

<bundles_post_ra>
// kernel: tpu_custom_call.1
= control target key start
LH: loop header
LB: loop body
LE: loop exit
PB: predicated region body
PF: predicated region fallthrough
CT: control target
= control target key end

     0   :  { %s849_s0 = inlined_call_operand.hbm [shape: f32[14,128], index: 0, kind: input, shape index: {}]   ;;  %s850_s1 = inlined_call_operand.hbm [shape: f32[14,128], index: 1, kind: input, shape index: {}]   ;;  %s851_s2 = inlined_call_operand.hbm [shape: f32[14,128], index: 2, kind: input, shape index: {}]   ;;  %s852_s3 = inlined_call_operand.hbm [shape: f32[14,128], index: 3, kind: output, shape index: {}]  }
   0x1   :  { %853 = sst [smem:[#allocation13_spill]] %s850_s1 }
   0x2   :  { %8 = vsyncpa [#allocation3], 0 }
   0x3   :  { %10 = vsyncpa [#allocation3 + $0x1], 0 }
   0x4   :  { %11 = vsyncpa [#allocation6], 0 }
   0x5   :  { %13 = vsyncpa [#allocation6 + $0x1], 0 }
   0x6   :  { %14 = vsyncpa [#allocation4], 0 }
   0x7   :  { %16 = vsyncpa [#allocation4 + $0x1], 0  ;;  %s663_s12 = smov 0   ;;  %s665_s13 = smov 0  }
   0x8   :  { %s667_s14 = smov 0   ;;  %s669_s15 = smov 0  }
   0x9 LB: > { %s684_s16 = sadd.s32 4294967295, %s641_s15   ;;  %s406_s17 = sadd.s32 4294967294, %s641_s15   ;;  %s641_s15 = sphi %s669_s15, %s865_s15   ;;  %s637_s14 = sphi %s667_s14, %s864_s14   ;;  %s633_s13 = sphi %s665_s13, %s863_s13   ;;  %s629_s12 = sphi %s663_s12, %s862_s12  }
   0xa   : > { %s688_s18 = sadd.s32 1, %s641_s15   ;;  %s29_s19 = sadd.s32 1, %s637_s14 }
   0xb   : > { %s26_s20 = ssub.s32 %s641_s15, %s688_s18  ;;  %p36_p0 = scmp.ne.s32.totalorder %s637_s14, %s633_s13 }
   0xc   : > { %p27_p1 = scmp.eq.s32.totalorder %s26_s20, 0  ;;  %p37_p2 = scmp.eq.s32.totalorder %s641_s15, 0 }
   0xd   : > { %p42_p3 = scmp.ne.s32.totalorder %s633_s13, %s629_s12  ;;  %p43_p4 = scmp.eq.s32.totalorder %s684_s16, 0 }
   0xe   : > { %s700_s21 = scalar_select %p27_p1, %s637_s14, %s29_s19  }
   0xf   : > { %p38_p5 = por %p37_p2, %p36_p0  ;;  %p702_p6 = por %p43_p4, %p42_p3 }
  0x10   : > { %854 = sst [smem:[#allocation12_spill]] %s700_s21  ;;  %p118_p7 = scmp.eq.s32.totalorder %s684_s16, 1 }
  0x11   : > { %p124_p8 = scmp.eq.s32.totalorder %s406_s17, 1  ;;  %p408_p9 = scmp.ge.s32.totalorder %s641_s15, 2 }
  0x12   : > { %p447_p10 = scmp.lt.s32.totalorder %s641_s15, 2  ;;  %p709_p11 = por %p118_p7, %p36_p0 }
  0x13   : > { %p713_p12 = por %p124_p8, %p42_p3  ;;  %s144_s25 = sand.u32 1, %s637_s14  }
  0x14   : > { %s719_s26 = sshll.u32 %s641_s15, 3  ;;  %s723_s27 = sshll.u32 %s144_s25, 3 }
  0x15   : > { %p725_p13 = pnand %p447_p10, %p38_p5  ;;  %s163_s29 = sand.u32 1, %s641_s15  }
  0x16   : > { %s859_s1 = sld [smem:[#allocation13_spill]]  ;;  %s167_s6 = scalar_lea.vmem [#allocation5], %s723_s27 }
  0x17   : > { %s175_s7 = sshll.u32 %s167_s6, 4  ;;  %p415_p0 = scmp.ge.s32.totalorder %s641_s15, 1  ;;  %s176_s7 = int_to_ptr.vmem [resolvable:$true] %s175_s7 }
  0x18   : > { %s736_s9 = scalar_lea.sflag [#allocation6], %s163_s29  ;;  %p485_p2 = pneg %p725_p13 }
  0x1c   : > { %s171_s5 = scalar_lea.hbm %s859_s1, %s719_s26  ;;  %s488_s20 = scalar_lea.hbm %s859_s1, 16 }
  0x1d   : > { %s173_s8 = sshll.u32 %s171_s5, 4  ;;  %s174_s8 = int_to_ptr.hbm [resolvable:$true] %s173_s8 }
  0x1e   : > { %s481_s10 = sshra.s32 %s174_s8, 4  ;;  %s482_s10 = int_to_ptr.hbm [resolvable:$true] %s481_s10 }
  0x1f   : > { %s483_s11 = scalar_lea.hbm %s482_s10, 8  ;;  %p489_p5 = scmp.lt.s32.totalorder %s482_s10, %s859_s1 }
  0x20   : > { %p484_p1 = scmp.ne.s32.totalorder %s482_s10, %s483_s11  ;;  %p490_p7 = scmp.lt.s32.totalorder %s488_s20, %s483_s11 }
  0x22   : > { %p486_p3 = pnand %p485_p2, %p484_p1  ;;  %p491_p8 = por %p490_p7, %p489_p5 }
  0x24   : > { %p487_p4 = pneg %p486_p3 }
  0x26   : > { %p492_p10 = pnand %p491_p8, %p487_p4 }
  0x28   : > { %495 = shalt.err (!%p492_p10)
}
  0x29   : > { %439 = dma.hbm_to_vmem [thread:$0]  (!%p725_p13), %s174_s8, 128, %s176_s7, %s736_s9  }
  0x2a   : > { %p199_p1 = scmp.lt.s32.totalorder %s641_s15, 3  ;;  %s152_s6 = scalar_lea.hbm %s849_s0, %s719_s26 }
  0x2b   : > { %s154_s11 = sshll.u32 %s152_s6, 4  ;;  %s148_s17 = scalar_lea.vmem [#allocation2], %s723_s27  ;;  %s155_s11 = int_to_ptr.hbm [resolvable:$true] %s154_s11 }
  0x2c   : > { %p759_p3 = pnand %p415_p0, %p199_p1  ;;  %s156_s19 = sshll.u32 %s148_s17, 4  ;;  %s157_s19 = int_to_ptr.vmem [resolvable:$true] %s156_s19 }
  0x2d   : > { %s145_s20 = scalar_lea.sflag [#allocation3], %s144_s25  ;;  %s511_s30 = sshra.s32 %s155_s11, 4  ;;  %s512_s30 = int_to_ptr.hbm [resolvable:$true] %s511_s30 }
  0x2e   : > { %s513_s7 = scalar_lea.hbm %s512_s30, 8  ;;  %s518_s29 = scalar_lea.hbm %s849_s0, 16 }
  0x2f   : > { %p514_p4 = scmp.ne.s32.totalorder %s512_s30, %s513_s7  ;;  %p519_p0 = scmp.lt.s32.totalorder %s512_s30, %s849_s0 }
  0x30   : > { %p520_p8 = scmp.lt.s32.totalorder %s518_s29, %s513_s7 }
  0x31   : > { %p516_p5 = pnand %p514_p4, %p485_p2 }
  0x32   : > { %p521_p10 = por %p520_p8, %p519_p0 }
  0x33   : > { %p517_p7 = pneg %p516_p5 }
  0x35   : > { %p522_p1 = pnand %p521_p10, %p517_p7 }
  0x37   : > { %525 = shalt.err (!%p522_p1)
}
  0x38   : > { %436 = dma.hbm_to_vmem [thread:$0]  (!%p725_p13), %s155_s11, 128, %s157_s19, %s145_s20  }
  0x39   : > { %s190_s1 = scalar_lea.hbm %s851_s2, %s719_s26  ;;  %s186_s8 = scalar_lea.vmem [#allocation7], %s723_s27 }
  0x3a   : > { %s194_s4 = sshll.u32 %s186_s8, 4  ;;  %s192_s21 = sshll.u32 %s190_s1, 4  ;;  %s195_s4 = int_to_ptr.vmem [resolvable:$true] %s194_s4  ;;  %s193_s21 = int_to_ptr.hbm [resolvable:$true] %s192_s21 }
  0x3b   : > { %s541_s30 = sshra.s32 %s193_s21, 4  ;;  %s548_s11 = scalar_lea.hbm %s851_s2, 16  ;;  %s542_s30 = int_to_ptr.hbm [resolvable:$true] %s541_s30 }
  0x3c   : > { %s543_s7 = scalar_lea.hbm %s542_s30, 8  ;;  %p549_p0 = scmp.lt.s32.totalorder %s542_s30, %s851_s2 }
  0x3d   : > { %p544_p4 = scmp.ne.s32.totalorder %s542_s30, %s543_s7  ;;  %p550_p8 = scmp.lt.s32.totalorder %s548_s11, %s543_s7 }
  0x3f   : > { %p546_p5 = pnand %p544_p4, %p485_p2  ;;  %p551_p10 = por %p550_p8, %p549_p0 }
  0x41   : > { %p547_p7 = pneg %p546_p5 }
  0x43   : > { %p552_p1 = pnand %p551_p10, %p547_p7 }
  0x45   : > { %555 = shalt.err (!%p552_p1)
}
  0x46   : > { %442 = dma.hbm_to_vmem [thread:$0]  (!%p725_p13), %s193_s21, 128, %s195_s4, %s736_s9  }
  0x47   : > { %203 = sbr.rel (%p759_p3) target bundleno = 97 (0x61), region = 32  ;;  %s797_s1 = sand.u32 (!%p759_p3), 1, %s633_s13  }
  0x48   : > { %s800_s26 = sshll.u32 (!%p759_p3), %s797_s1, 3  ;;  %s206_s27 = scalar_lea.sflag (!%p759_p3), [#allocation3], %s797_s1 }
  0x49   : > { %s209_s6 = scalar_lea.vmem (!%p759_p3), [#allocation2], %s800_s26 }
  0x4c   : > { %616 = dma.done.wait (%p702_p6), %s206_s27, 128  }
  0x4d   : > { %618 = vsyncadd (%p702_p6), %s206_s27, 4294967168  ;;  %s215_s21 = sand.u32 1, %s684_s16   ;;  %s219_s9 = scalar_lea.vmem [#allocation5], %s800_s26 }
  0x4e   : > { %s216_s28 = scalar_lea.sflag [#allocation6], %s215_s21 }
  0x4f   : > { %620 = dma.done.wait (%p702_p6), %s216_s28, 256  }
  0x50   : > { %622 = vsyncadd (%p702_p6), %s216_s28, 4294967040  ;;  %v263_v0 = vld [vmem:[%s209_s6] sm:$0xff]  ;;  %v264_v1 = vld [vmem:[%s219_s9] sm:$0xff]  ;;  %s422_s10 = sshll.u32 %s684_s16, 3  ;;  %s229_s22 = scalar_lea.vmem [#allocation7], %s800_s26 }
  0x51   : > { %vm266_vm0 = vcmp.ne.f32.partialorder %v264_v1, %v264_v1  ;;  %s288_s8 = scalar_lea.hbm %s852_s3, %s422_s10  ;;  %v265_v7 = vld [vmem:[%s229_s22] sm:$0xff]  ;;  %s262_s4 = scalar_lea.vmem [#allocation8], %s800_s26 }
  0x52   : > { %v267_v2 = vsel %vm266_vm0, %v263_v0, %v264_v1  ;;  %s290_s30 = sshll.u32 %s262_s4, 4  ;;  %s292_s7 = sshll.u32 %s288_s8, 4  ;;  %s291_s30 = int_to_ptr.vmem [resolvable:$true] %s290_s30  ;;  %s293_s7 = int_to_ptr.hbm [resolvable:$true] %s292_s7 }
  0x53   : > { %v268_v3 = vsub.f32 %v263_v0, %v267_v2  ;;  %s278_s16 = scalar_lea.sflag [#allocation4], %s797_s1  ;;  %s585_s29 = sshra.s32 %s293_s7, 4  ;;  %s586_s29 = int_to_ptr.hbm [resolvable:$true] %s585_s29 }
  0x54   : > { %s587_s5 = scalar_lea.hbm %s586_s29, 8  ;;  %s591_s20 = scalar_lea.hbm %s852_s3, 16 }
  0x55   : > { %v269_v4 = vand.u32 2147483647, %v268_v3  ;;  %p588_p6 = scmp.ne.s32.totalorder %s586_s29, %s587_s5  ;;  %p592_p3 = scmp.lt.s32.totalorder %s586_s29, %s852_s3 }
  0x56   : > { %p593_p4 = scmp.lt.s32.totalorder %s591_s20, %s587_s5 }
  0x57   : > { %v271_v5 = vmul.f32 %v269_v4, %v269_v4  ;;  %v420_v6 = vadd.f32 -0.055555556, %v269_v4  ;;  %vm270_vm1 = vcmp.lt.f32.partialorder %v269_v4, 0.11111111  ;;  %p589_p13 = pnand %p588_p6, %p709_p11 }
  0x58   : > { %p594_p5 = por %p593_p4, %p592_p3 }
  0x59   : > { %v272_v8 = vmul.f32 4.5, %v271_v5  ;;  %p590_p2 = pneg %p589_p13 }
  0x5b   : > { %v274_v9 = vsel %vm270_vm1, %v272_v8, %v420_v6  ;;  %p595_p7 = pnand %p594_p5, %p590_p2 }
  0x5c   : > { %v275_v10 = vmul.f32 %v274_v9, %v265_v7 }
  0x5e   : > { %276 = vst [vmem:[%s262_s4] sm:$0xff] %v275_v10 }
  0x5f   : > { %598 = shalt.err (!%p595_p7)
}
  0x60   : > { %431 = dma.vmem_to_hbm [thread:$0]  (%p709_p11), %s291_s30, 128, %s293_s7, %s278_s16  }
  0x61 PF: > { %s304_s1 = sand.u32 1, %s629_s12   ;;  %p444_p0 = pnand %p408_p9, %p713_p12 }
  0x62   : > { %s305_s6 = scalar_lea.sflag [#allocation4], %s304_s1 }
  0x63   : > { %p445_p8 = pneg %p444_p0 }
  0x65   : > { %624 = dma.done.wait (%p445_p8), %s305_s6, 128  }
  0x66   : > { %626 = vsyncadd (%p445_p8), %s305_s6, 4294967168  ;;  %s861_s21 = sld [smem:[#allocation12_spill]]  ;;  %p19_p10 = scmp.ge.s32.totalorder %s688_s18, 4  }
  0x67   : > { %s862_s12 = smov %s633_s13  ;;  %s863_s13 = smov %s637_s14 }
  0x68   : > { %s865_s15 = smov %s688_s18  ;;  %21 = sbr.rel (!%p19_p10) target bundleno = 9 (0x9), region = 101 }
  0x6c   : > { %s864_s14 = smov %s861_s21 }
  0x6d   :  { %311 = vsyncpa [#allocation3], 1 }
  0x6e   :  { %313 = vsyncpa [#allocation3 + $0x1], 1 }
  0x6f   :  { %314 = vsyncpa [#allocation6], 1 }
  0x70   :  { %316 = vsyncpa [#allocation6 + $0x1], 1 }
  0x71   :  { %317 = vsyncpa [#allocation4], 1 }
  0x72   :  { %319 = vsyncpa [#allocation4 + $0x1], 1 }

</bundles_post_ra>
